<compile_context>
chip_gen: v7x
topology: tpu7x:2x2x1
jax: 0.10.0
libtpu: 0.0.40
codegen_flags: <defaults>
</compile_context>

<pallas_src>
import jax
import jax.numpy as jnp
from jax import lax
from jax.experimental import pallas as pl
from jax.experimental.pallas import tpu as pltpu


def _mlp_kernel(x_ref,
                w1_ref, b1_ref,
                w2_ref, b2_ref,
                w3_ref, b3_ref,
                w4_ref, b4_ref,
                w5_ref, b5_ref,
                o_ref):
    # MXU-operand dtype (f32 or bf16); accumulation + elementwise math stay in f32.
    cdt = w1_ref.dtype

    # Layer 1: contract the feature dim of W1 (64, in) and x (TB, in) -> (64, TB).
    # Batch lands on the 128-lane axis; no explicit transpose is materialized.
    x = x_ref[...].astype(cdt)
    h = lax.dot_general(w1_ref[...], x, (((1,), (1,)), ((), ())),
                        preferred_element_type=jnp.float32)
    h = jnp.maximum(h + b1_ref[...], 0.0)

    # Hidden layers: (out, in) @ (in, TB) -> (out, TB), bias (out, 1) broadcasts
    # along lanes, ReLU on the VPU in f32.
    h = jnp.dot(w2_ref[...], h.astype(cdt), preferred_element_type=jnp.float32)
    h = jnp.maximum(h + b2_ref[...], 0.0)
    h = jnp.dot(w3_ref[...], h.astype(cdt), preferred_element_type=jnp.float32)
    h = jnp.maximum(h + b3_ref[...], 0.0)
    h = jnp.dot(w4_ref[...], h.astype(cdt), preferred_element_type=jnp.float32)
    h = jnp.maximum(h + b4_ref[...], 0.0)

    # Final layer -> (out_dim, TB): the store is lane-dense (batch on lanes).
    z = jnp.dot(w5_ref[...], h.astype(cdt), preferred_element_type=jnp.float32)
    z = z + b5_ref[...]

    # Numerically stable sigmoid: sigmoid(z) = 0.5 * (tanh(z/2) + 1)  (EUP tanh).
    o_ref[...] = (0.5 * (jnp.tanh(0.5 * z) + 1.0)).astype(o_ref.dtype)


def _round_up(n, m):
    return ((n + m - 1) // m) * m


def mlp_forward(x, params, *, tile_batch=2048, compute_dtype=jnp.bfloat16):
    """x: [B, input_dim] f32.  params: list of (W [out,in], b [out,1]) in f32."""
    B, in_dim = x.shape
    out_dim = params[-1][0].shape[0]

    # Batch-tile selection:
    #  * tiny batches: a single full-extent tile (no (8,128) constraint applies);
    #  * otherwise tb is a multiple of 128 (keeps the lane-major (out_dim, tb)
    #    output block legal) and the grid has >= 2 tiles so both v7x TensorCores
    #    get work under dimension_semantics=("parallel",).
    if B <= 256:
        tb = B
    else:
        n_tiles = max(2, pl.cdiv(B, tile_batch))
        tb = min(tile_batch, _round_up(pl.cdiv(B, n_tiles), 128))
    grid = (pl.cdiv(B, tb),)

    # x tile streamed over the batch (double-buffered by Pallas); x is passed in its
    # original f32 layout -- the (cheap, MXU-hidden) bf16 cast happens in-kernel.
    in_specs = [pl.BlockSpec((tb, in_dim), lambda i: (i, 0))]
    args = [x]

    # Weights/biases: full blocks with constant index_maps -> fetched once and kept
    # VMEM-resident across all batch tiles (Pallas skips re-DMA on same block index).
    def const_spec(shape):
        return pl.BlockSpec(shape, lambda i: (0, 0))

    for w, b in params:
        in_specs.append(const_spec(w.shape))          # (out, in)
        in_specs.append(const_spec(b.shape))          # (out, 1)
        args.append(w.astype(compute_dtype))          # MXU operand dtype
        args.append(b.astype(jnp.float32))            # f32 elementwise path

    # Output kept feature-major (out_dim, B): batch on lanes -> lane-dense stores.
    out_shape = jax.ShapeDtypeStruct((out_dim, B), jnp.float32)
    out_spec = pl.BlockSpec((out_dim, tb), lambda i: (0, i))

    out = pl.pallas_call(
        _mlp_kernel,
        out_shape=out_shape,
        grid=grid,
        in_specs=in_specs,
        out_specs=out_spec,
        compiler_params=pltpu.CompilerParams(
            # Batch tiles are independent -> megacore-shard across TCs on v7x.
            dimension_semantics=("parallel",),
        ),
    )(*args)

    # (1, B) -> (B, 1) is layout-identical (free reshape); general out_dim transposes.
    if out_dim == 1:
        return out.reshape(B, 1)
    return out.T


def init_params(key, input_dim, output_dim):
    """Deterministic init mimicking nn.Linear (uniform(-1/sqrt(in), 1/sqrt(in))).

    Weights are stored in PyTorch's natural (out_features, in_features) layout,
    biases as (out_features, 1) so they broadcast along the lane (batch) axis.
    """
    dims = [input_dim, 64, 32, 32, 16, output_dim]
    params = []
    for i in range(5):
        fan_in, fan_out = dims[i], dims[i + 1]
        key, kw, kb = jax.random.split(key, 3)
        bound = 1.0 / (fan_in ** 0.5)
        w = jax.random.uniform(kw, (fan_out, fan_in), jnp.float32, -bound, bound)
        b = jax.random.uniform(kb, (fan_out, 1), jnp.float32, -bound, bound)
        params.append((w, b))
    return params


def reference_forward(x, params):
    h = x
    for i, (w, b) in enumerate(params):
        h = h @ w.T + b.T
        if i < len(params) - 1:
            h = jnp.maximum(h, 0.0)
    return jax.nn.sigmoid(h)


if __name__ == "__main__":
    # Kaggle bank-churn tabular data: 10 numeric features, binary output.
    input_dim, output_dim = 10, 1
    key = jax.random.PRNGKey(0)
    key, kx = jax.random.split(key)
    params = init_params(key, input_dim, output_dim)

    # Small batch: single full-extent tile path, f32 MXU operands (tight tolerance).
    batch = 16
    x_small = jax.random.normal(kx, (batch, input_dim), jnp.float32)
    out = jax.block_until_ready(
        mlp_forward(x_small, params, compute_dtype=jnp.float32))
    ref = reference_forward(x_small, params)
    assert out.shape == (batch, output_dim)
    assert jnp.allclose(out, ref, atol=1e-4, rtol=1e-4), "f32 small-batch mismatch"

    # Larger batch: tiled path (>=2 grid tiles, partial last tile), bf16 MXU default.
    key, kx2 = jax.random.split(key)
    big = 1000
    x_big = jax.random.normal(kx2, (big, input_dim), jnp.float32)
    out_big = jax.block_until_ready(mlp_forward(x_big, params))
    ref_big = reference_forward(x_big, params)
    assert out_big.shape == (big, output_dim)
    assert jnp.allclose(out_big, ref_big, atol=5e-2, rtol=5e-2), "bf16 tiled mismatch"

    # TODO(synk): nn.Dropout(0.2) is declared in __init__ but never used in forward;
    # it stays omitted here (would only matter for a training-mode kernel).
    print("KERNEL_OK")
</pallas_src>

<mosaic_0001>
module attributes {stable_mosaic.version = 11 : i64} {
  func.func @_mlp_kernel(%arg0: i32, %arg1: memref<16x10xf32, #tpu.memory_space<vmem>>, %arg2: memref<64x10xf32, #tpu.memory_space<vmem>>, %arg3: memref<64x1xf32, #tpu.memory_space<vmem>>, %arg4: memref<32x64xf32, #tpu.memory_space<vmem>>, %arg5: memref<32x1xf32, #tpu.memory_space<vmem>>, %arg6: memref<32x32xf32, #tpu.memory_space<vmem>>, %arg7: memref<32x1xf32, #tpu.memory_space<vmem>>, %arg8: memref<16x32xf32, #tpu.memory_space<vmem>>, %arg9: memref<16x1xf32, #tpu.memory_space<vmem>>, %arg10: memref<1x16xf32, #tpu.memory_space<vmem>>, %arg11: memref<1x1xf32, #tpu.memory_space<vmem>>, %arg12: memref<1x16xf32, #tpu.memory_space<vmem>>) attributes {dimension_semantics = [#tpu.dimension_semantics<parallel>], iteration_bounds = array<i64: 1>, scalar_prefetch = 0 : i64, scratch_operands = 0 : i64, tpu.core_type = #tpu.core_type<tc>, window_params = [{transform_indices = @transform_0, window_bounds = array<i64: 16, 10>}, {pipeline_mode = #tpu.pipeline_mode<synchronous>, transform_indices = @transform_1, window_bounds = array<i64: 64, 10>}, {pipeline_mode = #tpu.pipeline_mode<synchronous>, transform_indices = @transform_2, window_bounds = array<i64: 64, 1>}, {pipeline_mode = #tpu.pipeline_mode<synchronous>, transform_indices = @transform_3, window_bounds = array<i64: 32, 64>}, {pipeline_mode = #tpu.pipeline_mode<synchronous>, transform_indices = @transform_4, window_bounds = array<i64: 32, 1>}, {pipeline_mode = #tpu.pipeline_mode<synchronous>, transform_indices = @transform_5, window_bounds = array<i64: 32, 32>}, {pipeline_mode = #tpu.pipeline_mode<synchronous>, transform_indices = @transform_6, window_bounds = array<i64: 32, 1>}, {pipeline_mode = #tpu.pipeline_mode<synchronous>, transform_indices = @transform_7, window_bounds = array<i64: 16, 32>}, {pipeline_mode = #tpu.pipeline_mode<synchronous>, transform_indices = @transform_8, window_bounds = array<i64: 16, 1>}, {pipeline_mode = #tpu.pipeline_mode<synchronous>, transform_indices = @transform_9, window_bounds = array<i64: 1, 16>}, {pipeline_mode = #tpu.pipeline_mode<synchronous>, transform_indices = @transform_10, window_bounds = array<i64: 1, 1>}, {transform_indices = @transform_11, window_bounds = array<i64: 1, 16>}]} {
    %c0 = arith.constant 0 : index
    %c0_0 = arith.constant 0 : index
    %0 = vector.load %arg1[%c0, %c0_0] : memref<16x10xf32, #tpu.memory_space<vmem>>, vector<16x10xf32>
    %c0_1 = arith.constant 0 : index
    %c0_2 = arith.constant 0 : index
    %1 = vector.load %arg2[%c0_1, %c0_2] : memref<64x10xf32, #tpu.memory_space<vmem>>, vector<64x10xf32>
    %cst = arith.constant dense<0.000000e+00> : vector<64x16xf32>
    %2 = tpu.matmul %1, %0, %cst {dimension_numbers = #tpu.dot_dimension_numbers<[1], [1], [0], [0], [0, 0, 1, 0], [], []>} : vector<64x10xf32>, vector<16x10xf32>, vector<64x16xf32> -> vector<64x16xf32>
    %c0_3 = arith.constant 0 : index
    %c0_4 = arith.constant 0 : index
    %3 = vector.load %arg3[%c0_3, %c0_4] : memref<64x1xf32, #tpu.memory_space<vmem>>, vector<64x1xf32>
    %4 = vector.broadcast %3 : vector<64x1xf32> to vector<64x16xf32>
    %5 = arith.addf %2, %4 : vector<64x16xf32>
    %cst_5 = arith.constant 0.000000e+00 : f32
    %6 = vector.broadcast %cst_5 : f32 to vector<64x16xf32>
    %7 = arith.maximumf %5, %6 : vector<64x16xf32>
    %c0_6 = arith.constant 0 : index
    %c0_7 = arith.constant 0 : index
    %8 = vector.load %arg4[%c0_6, %c0_7] : memref<32x64xf32, #tpu.memory_space<vmem>>, vector<32x64xf32>
    %cst_8 = arith.constant dense<0.000000e+00> : vector<32x16xf32>
    %9 = tpu.matmul %8, %7, %cst_8 {dimension_numbers = #tpu.dot_dimension_numbers<[1], [0], [0], [1], [0, 0, 1, 1], [], []>} : vector<32x64xf32>, vector<64x16xf32>, vector<32x16xf32> -> vector<32x16xf32>
    %c0_9 = arith.constant 0 : index
    %c0_10 = arith.constant 0 : index
    %10 = vector.load %arg5[%c0_9, %c0_10] : memref<32x1xf32, #tpu.memory_space<vmem>>, vector<32x1xf32>
    %11 = vector.broadcast %10 : vector<32x1xf32> to vector<32x16xf32>
    %12 = arith.addf %9, %11 : vector<32x16xf32>
    %cst_11 = arith.constant 0.000000e+00 : f32
    %13 = vector.broadcast %cst_11 : f32 to vector<32x16xf32>
    %14 = arith.maximumf %12, %13 : vector<32x16xf32>
    %c0_12 = arith.constant 0 : index
    %c0_13 = arith.constant 0 : index
    %15 = vector.load %arg6[%c0_12, %c0_13] : memref<32x32xf32, #tpu.memory_space<vmem>>, vector<32x32xf32>
    %cst_14 = arith.constant dense<0.000000e+00> : vector<32x16xf32>
    %16 = tpu.matmul %15, %14, %cst_14 {dimension_numbers = #tpu.dot_dimension_numbers<[1], [0], [0], [1], [0, 0, 1, 1], [], []>} : vector<32x32xf32>, vector<32x16xf32>, vector<32x16xf32> -> vector<32x16xf32>
    %c0_15 = arith.constant 0 : index
    %c0_16 = arith.constant 0 : index
    %17 = vector.load %arg7[%c0_15, %c0_16] : memref<32x1xf32, #tpu.memory_space<vmem>>, vector<32x1xf32>
    %18 = vector.broadcast %17 : vector<32x1xf32> to vector<32x16xf32>
    %19 = arith.addf %16, %18 : vector<32x16xf32>
    %cst_17 = arith.constant 0.000000e+00 : f32
    %20 = vector.broadcast %cst_17 : f32 to vector<32x16xf32>
    %21 = arith.maximumf %19, %20 : vector<32x16xf32>
    %c0_18 = arith.constant 0 : index
    %c0_19 = arith.constant 0 : index
    %22 = vector.load %arg8[%c0_18, %c0_19] : memref<16x32xf32, #tpu.memory_space<vmem>>, vector<16x32xf32>
    %cst_20 = arith.constant dense<0.000000e+00> : vector<16x16xf32>
    %23 = tpu.matmul %22, %21, %cst_20 {dimension_numbers = #tpu.dot_dimension_numbers<[1], [0], [0], [1], [0, 0, 1, 1], [], []>} : vector<16x32xf32>, vector<32x16xf32>, vector<16x16xf32> -> vector<16x16xf32>
    %c0_21 = arith.constant 0 : index
    %c0_22 = arith.constant 0 : index
    %24 = vector.load %arg9[%c0_21, %c0_22] : memref<16x1xf32, #tpu.memory_space<vmem>>, vector<16x1xf32>
    %25 = vector.broadcast %24 : vector<16x1xf32> to vector<16x16xf32>
    %26 = arith.addf %23, %25 : vector<16x16xf32>
    %cst_23 = arith.constant 0.000000e+00 : f32
    %27 = vector.broadcast %cst_23 : f32 to vector<16x16xf32>
    %28 = arith.maximumf %26, %27 : vector<16x16xf32>
    %c0_24 = arith.constant 0 : index
    %c0_25 = arith.constant 0 : index
    %29 = vector.load %arg10[%c0_24, %c0_25] : memref<1x16xf32, #tpu.memory_space<vmem>>, vector<1x16xf32>
    %cst_26 = arith.constant dense<0.000000e+00> : vector<1x16xf32>
    %30 = tpu.matmul %29, %28, %cst_26 {dimension_numbers = #tpu.dot_dimension_numbers<[1], [0], [0], [1], [0, 0, 1, 1], [], []>} : vector<1x16xf32>, vector<16x16xf32>, vector<1x16xf32> -> vector<1x16xf32>
    %c0_27 = arith.constant 0 : index
    %c0_28 = arith.constant 0 : index
    %31 = vector.load %arg11[%c0_27, %c0_28] : memref<1x1xf32, #tpu.memory_space<vmem>>, vector<1x1xf32>
    %32 = vector.broadcast %31 : vector<1x1xf32> to vector<1x16xf32>
    %33 = arith.addf %30, %32 : vector<1x16xf32>
    %cst_29 = arith.constant 5.000000e-01 : f32
    %34 = vector.broadcast %cst_29 : f32 to vector<1x16xf32>
    %35 = arith.mulf %34, %33 : vector<1x16xf32>
    %36 = math.tanh %35 : vector<1x16xf32>
    %cst_30 = arith.constant 1.000000e+00 : f32
    %37 = vector.broadcast %cst_30 : f32 to vector<1x16xf32>
    %38 = arith.addf %36, %37 : vector<1x16xf32>
    %cst_31 = arith.constant 5.000000e-01 : f32
    %39 = vector.broadcast %cst_31 : f32 to vector<1x16xf32>
    %40 = arith.mulf %39, %38 : vector<1x16xf32>
    %c0_32 = arith.constant 0 : index
    %c0_33 = arith.constant 0 : index
    %41 = vector.load %arg12[%c0_32, %c0_33] : memref<1x16xf32, #tpu.memory_space<vmem>>, vector<1x16xf32>
    tpu.vector_store %arg12[%c0_32, %c0_33], %40 {strides = array<i32>} : memref<1x16xf32, #tpu.memory_space<vmem>>, vector<1x16xf32>,
    return
  }
  func.func @transform_0(%arg0: i32) -> (i32, i32) {
    %c0_i32 = arith.constant 0 : i32
    %c0_i32_0 = arith.constant 0 : i32
    return %arg0, %c0_i32 : i32, i32
  }
  func.func @transform_1(%arg0: i32) -> (i32, i32) {
    %c0_i32 = arith.constant 0 : i32
    %c0_i32_0 = arith.constant 0 : i32
    %c0_i32_1 = arith.constant 0 : i32
    return %c0_i32, %c0_i32_0 : i32, i32
  }
  func.func @transform_2(%arg0: i32) -> (i32, i32) {
    %c0_i32 = arith.constant 0 : i32
    %c0_i32_0 = arith.constant 0 : i32
    %c0_i32_1 = arith.constant 0 : i32
    return %c0_i32, %c0_i32_0 : i32, i32
  }
  func.func @transform_3(%arg0: i32) -> (i32, i32) {
    %c0_i32 = arith.constant 0 : i32
    %c0_i32_0 = arith.constant 0 : i32
    %c0_i32_1 = arith.constant 0 : i32
    return %c0_i32, %c0_i32_0 : i32, i32
  }
  func.func @transform_4(%arg0: i32) -> (i32, i32) {
    %c0_i32 = arith.constant 0 : i32
    %c0_i32_0 = arith.constant 0 : i32
    %c0_i32_1 = arith.constant 0 : i32
    return %c0_i32, %c0_i32_0 : i32, i32
  }
  func.func @transform_5(%arg0: i32) -> (i32, i32) {
    %c0_i32 = arith.constant 0 : i32
    %c0_i32_0 = arith.constant 0 : i32
    %c0_i32_1 = arith.constant 0 : i32
    return %c0_i32, %c0_i32_0 : i32, i32
  }
  func.func @transform_6(%arg0: i32) -> (i32, i32) {
    %c0_i32 = arith.constant 0 : i32
    %c0_i32_0 = arith.constant 0 : i32
    %c0_i32_1 = arith.constant 0 : i32
    return %c0_i32, %c0_i32_0 : i32, i32
  }
  func.func @transform_7(%arg0: i32) -> (i32, i32) {
    %c0_i32 = arith.constant 0 : i32
    %c0_i32_0 = arith.constant 0 : i32
    %c0_i32_1 = arith.constant 0 : i32
    return %c0_i32, %c0_i32_0 : i32, i32
  }
  func.func @transform_8(%arg0: i32) -> (i32, i32) {
    %c0_i32 = arith.constant 0 : i32
    %c0_i32_0 = arith.constant 0 : i32
    %c0_i32_1 = arith.constant 0 : i32
    return %c0_i32, %c0_i32_0 : i32, i32
  }
  func.func @transform_9(%arg0: i32) -> (i32, i32) {
    %c0_i32 = arith.constant 0 : i32
    %c0_i32_0 = arith.constant 0 : i32
    %c0_i32_1 = arith.constant 0 : i32
    return %c0_i32, %c0_i32_0 : i32, i32
  }
  func.func @transform_10(%arg0: i32) -> (i32, i32) {
    %c0_i32 = arith.constant 0 : i32
    %c0_i32_0 = arith.constant 0 : i32
    %c0_i32_1 = arith.constant 0 : i32
    return %c0_i32, %c0_i32_0 : i32, i32
  }
  func.func @transform_11(%arg0: i32) -> (i32, i32) {
    %c0_i32 = arith.constant 0 : i32
    %c0_i32_0 = arith.constant 0 : i32
    return %c0_i32, %arg0 : i32, i32
  }
}

</mosaic_0001>

<bundles_post_ra>
// kernel: tpu_custom_call.1
= control target key start
LH: loop header
LB: loop body
LE: loop exit
PB: predicated region body
PF: predicated region fallthrough
CT: control target
= control target key end

     0   :  { %s1126_s0 = inlined_call_operand.vmem [shape: f32[16,10], index: 0, kind: input, shape index: {}]   ;;  %s1127_s1 = inlined_call_operand.vmem [shape: f32[64,10], index: 1, kind: input, shape index: {}]   ;;  %s1128_s2 = inlined_call_operand.vmem [shape: f32[64,1], index: 2, kind: input, shape index: {}]   ;;  %s1129_s3 = inlined_call_operand.vmem [shape: f32[32,64], index: 3, kind: input, shape index: {}]   ;;  %s1130_s4 = inlined_call_operand.vmem [shape: f32[32,1], index: 4, kind: input, shape index: {}]   ;;  %s1131_s5 = inlined_call_operand.vmem [shape: f32[32,32], index: 5, kind: input, shape index: {}]   ;;  %s1132_s6 = inlined_call_operand.vmem [shape: f32[32,1], index: 6, kind: input, shape index: {}]   ;;  %s1133_s7 = inlined_call_operand.vmem [shape: f32[16,32], index: 7, kind: input, shape index: {}]   ;;  %s1134_s8 = inlined_call_operand.vmem [shape: f32[16,1], index: 8, kind: input, shape index: {}]   ;;  %s1135_s9 = inlined_call_operand.vmem [shape: f32[1,16], index: 9, kind: input, shape index: {}]   ;;  %s1136_s10 = inlined_call_operand.<no memory space> [shape: f32[1,1], index: 10, kind: input, shape index: {}]   ;;  %s1137_s11 = inlined_call_operand.hbm [shape: f32[1,16], index: 11, kind: output, shape index: {}]  }
   0x1   :  { %v16_v0 = vstv %s1136_s10 }
   0x2   :  { %17 = vst [vmem:[#allocation2] sm:$0x1] %v16_v0 }
   0x3   :  { %v41_v1 = vld [vmem:[%s1126_s0] sm:$0xff]  ;;  %v42_v2 = vld [vmem:[%s1126_s0 + $0x8] sm:$0xff]  ;;  %vm99_vm0 = vcmask 80896   ;;  %v909_v5 = vmov 0   ;;  %v53_v7 = vld [vmem:[%s1128_s2 + $0x10] sm:$0xff] }
   0x4   :  { %v43_v3 = vld [vmem:[%s1127_s1] sm:$0xff]  ;;  %v835_v4 = vpack.c.bf16 %v42_v2, %v41_v1  ;;  %vm836_vm1 = vmpackc.low %vm99_vm0, %vm99_vm0  ;;  %881 = vset.pattern.permute.xlu0 %v909_v5  ;;  %882 = vset.pattern.permute.xlu1 %v909_v5  ;;  %v52_v8 = vld [vmem:[%s1128_s2 + $0x8] sm:$0xff] }
   0x5   :  { %769 = vmatprep.mubr.msk.f32.mxu0 %vm99_vm0, %v43_v3  ;;  %v51_v6 = vld [vmem:[%s1128_s2] sm:$0xff]  ;;  %71 = vperm.xlu1 %882, %v53_v7   ;;  %v54_v9 = vld [vmem:[%s1128_s2 + $0x18] sm:$0xff]  ;;  %v44_v10 = vld [vmem:[%s1127_s1 + $0x8] sm:$0xff] }
   0x6   :  { %837 = vmatprep.subr.msk.bf16.mxu0 %vm836_vm1, %v835_v4  ;;  %61 = vperm.xlu0 %881, %v51_v6   ;;  %v45_v11 = vld [vmem:[%s1127_s1 + $0x10] sm:$0xff]  ;;  %v55_v12 = vld [vmem:[%s1128_s2 + $0x20] sm:$0xff]  ;;  %v56_v13 = vld [vmem:[%s1128_s2 + $0x28] sm:$0xff] }
   0x7   :  { %840 = vmatpush3.bf16.xpose.msk.msra.mxu0 %vm836_vm1, %v835_v4 }
   0x9   :  { %76 = vperm.xlu1 %882, %v54_v9  }
   0xa   :  { %66 = vperm.xlu0 %881, %v52_v8  }
   0xb   :  { %18 = vsyncpa [#allocation4], 0  ;;  %v46_v14 = vld [vmem:[%s1127_s1 + $0x18] sm:$0xff]  ;;  %v47_v15 = vld [vmem:[%s1127_s1 + $0x20] sm:$0xff]  ;;  %vm271_vm2 = vcmask 523264   ;;  %vm401_vm3 = vcmask 261120  }
   0xc   :  { %v57_v16 = vld [vmem:[%s1128_s2 + $0x30] sm:$0xff]  ;;  %v58_v17 = vld [vmem:[%s1128_s2 + $0x38] sm:$0xff]  ;;  %v48_v18 = vld [vmem:[%s1127_s1 + $0x28] sm:$0xff]  ;;  %vm911_vm4 = vmmov 0   ;;  %vm611_vm5 = vcmask 130048   ;;  %vm689_vm6 = vcmask 122880  }
   0xd   :  { %86 = vperm.xlu1 %882, %v56_v13   ;;  %v49_v19 = vld [vmem:[%s1127_s1 + $0x30] sm:$0xff]  ;;  %v247_v20 = vld [vmem:[%s1130_s4] sm:$0xff]  ;;  %v248_v21 = vld [vmem:[%s1130_s4 + $0x8] sm:$0xff] }
   0xe   :  { %770 = vmatmul.mubr.msk.f32.vlgmr.msra.gmra.mrb[0].mxu0 %vm99_vm0, %v44_v10  ;;  %81 = vperm.xlu0 %881, %v55_v12   ;;  %v50_v22 = vld [vmem:[%s1127_s1 + $0x38] sm:$0xff]  ;;  %v249_v23 = vld [vmem:[%s1130_s4 + $0x10] sm:$0xff]  ;;  %v377_v25 = vld [vmem:[%s1132_s6] sm:$0xff] }
   0xf   :  { %772 = vmatprep.mubr.msk.f32.mxu0 %vm99_vm0, %v45_v11  ;;  %v250_v24 = vld [vmem:[%s1130_s4 + $0x18] sm:$0xff]  ;;  %v378_v26 = vld [vmem:[%s1132_s6 + $0x8] sm:$0xff]  ;;  %v379_v27 = vld [vmem:[%s1132_s6 + $0x10] sm:$0xff] }
  0x10   :  { %v380_v28 = vld [vmem:[%s1132_s6 + $0x18] sm:$0xff]  ;;  %v505_v29 = vld [vmem:[%s1134_s8] sm:$0xff]  ;;  %v506_v30 = vld [vmem:[%s1134_s8 + $0x8] sm:$0xff] }
  0x11   :  { %96 = vperm.xlu1 %882, %v58_v17   ;;  %v601_v31 = vld [vmem:[#allocation2] sm:$0x1]  ;;  %v244_v5 = vld [vmem:[%s1129_s3 + $0x8] sm:$0xff]  ;;  %v245_v6 = vld [vmem:[%s1129_s3 + $0x10] sm:$0xff] }
  0x12   :  { %773 = vmatmul.mubr.msk.f32.gmra.mrb[2].mxu0 %vm99_vm0, %v46_v14  ;;  %91 = vperm.xlu0 %881, %v57_v16   ;;  %v243_v32 = vld [vmem:[%s1129_s3] sm:$0xff]  ;;  %v246_v7 = vld [vmem:[%s1129_s3 + $0x18] sm:$0xff] }
  0x13   :  { %775 = vmatprep.mubr.msk.f32.mxu0 %vm99_vm0, %v47_v15  ;;  %797 = vmatprep.mubr.msk.f32.mxu1 %vm271_vm2, %v243_v32  ;;  %v373_v8 = vld [vmem:[%s1131_s5] sm:$0xff] }
  0x15   :  { %258 = vperm.xlu1 %882, %v248_v21  }
  0x16   :  { %776 = vmatmul.mubr.msk.f32.gmra.mrb[4].mxu0 %vm99_vm0, %v48_v18  ;;  %253 = vperm.xlu0 %881, %v247_v20  }
  0x17   :  { %778 = vmatprep.mubr.msk.f32.mxu0 %vm99_vm0, %v49_v19 }
  0x19   :  { %268 = vperm.xlu1 %882, %v250_v24  }
  0x1a   :  { %779 = vmatmul.mubr.msk.f32.gmra.mrb[6].mxu0 %vm99_vm0, %v50_v22  ;;  %263 = vperm.xlu0 %881, %v249_v23  }
  0x1b   :  { %811 = vmatprep.mubr.msk.f32.mxu0 %vm401_vm3, %v373_v8 }
  0x1d   :  { %388 = vperm.xlu1 %882, %v378_v26  }
  0x1e   :  { %383 = vperm.xlu0 %881, %v377_v25  }
  0x21   :  { %398 = vperm.xlu1 %882, %v380_v28   ;;  %v375_v28 = vld [vmem:[%s1131_s5 + $0x10] sm:$0xff] }
  0x22   :  { %393 = vperm.xlu0 %881, %v379_v27   ;;  %v374_v27 = vld [vmem:[%s1131_s5 + $0x8] sm:$0xff] }
  0x25   :  { %514 = vperm.xlu1 %882, %v506_v30   ;;  %v503_v30 = vld [vmem:[%s1133_s7] sm:$0xff] }
  0x26   :  { %509 = vperm.xlu0 %881, %v505_v29   ;;  %v376_v29 = vld [vmem:[%s1131_s5 + $0x18] sm:$0xff] }
  0x2a   :  { %604 = vperm.xlu0 %881, %v601_v31  }
  0x84   :  { %v72_v34 = vpop.permute.xlu1 %71 }
  0x85   :  { %v62_v33 = vpop.permute.xlu0 %61 }
  0x88   :  { %v77_v36 = vpop.permute.xlu1 %76 }
  0x89   :  { %v67_v35 = vpop.permute.xlu0 %66 }
  0x8c   :  { %v87_v46 = vpop.permute.xlu1 %86 }
  0x8d   :  { %v82_v49 = vpop.permute.xlu0 %81 }
  0x90   :  { %v97_v58 = vpop.permute.xlu1 %96 }
  0x91   :  { %v92_v61 = vpop.permute.xlu0 %91 }
  0x94   :  { %v259_v9 = vpop.permute.xlu1 %258 }
  0x95   :  { %v254_v10 = vpop.permute.xlu0 %253 }
  0x98   :  { %v269_v16 = vpop.permute.xlu1 %268 }
  0x99   :  { %v264_v19 = vpop.permute.xlu0 %263 }
  0x9c   :  { %v389_v31 = vpop.permute.xlu1 %388 }
  0x9d   :  { %v384_v32 = vpop.permute.xlu0 %383 }
  0xe1   :  { %v771_v37 = vpop.f32.mrb[0].mxu0 }
  0xe2   :  { %v202_v38 = vadd.f32 %v771_v37, %v67_v35  ;;  %v196_v39 = vpop.f32.mrb[1].mxu0 }
  0xe3   :  { %v197_v40 = vadd.f32 %v196_v39, %v62_v33 }
  0xe4   :  { %v236_v41 = vmax.f32 %v202_v38, 0.0  ;;  %v399_v38 = vpop.permute.xlu1 %398 }
  0xe5   :  { %v235_v42 = vmax.f32 %v197_v40, 0.0  ;;  %v774_v43 = vpop.f32.mrb[2].mxu0 }
  0xe6   :  { %v212_v44 = vadd.f32 %v774_v43, %v77_v36  ;;  %v206_v45 = vpop.f32.mrb[3].mxu0 }
  0xe7   :  { %v207_v47 = vadd.f32 %v206_v45, %v72_v34  ;;  %v841_v48 = vpack.c.bf16 %v236_v41, %v235_v42  ;;  %v394_v41 = vpop.permute.xlu0 %393 }
  0xe8   :  { %v238_v50 = vmax.f32 %v212_v44, 0.0 }
  0xe9   :  { %v237_v51 = vmax.f32 %v207_v47, 0.0  ;;  %v777_v52 = vpop.f32.mrb[4].mxu0  ;;  %842 = vmatprep.subr.bf16.mxu1 %v841_v48 }
  0xea   :  { %v222_v53 = vadd.f32 %v777_v52, %v87_v46  ;;  %v216_v54 = vpop.f32.mrb[5].mxu0  ;;  %844 = vmatpush3.bf16.msra.mxu1 %v841_v48  ;;  %v515_v52 = vpop.permute.xlu1 %514 }
  0xeb   :  { %v845_v55 = vpack.c.bf16 %v238_v50, %v237_v51  ;;  %v217_v56 = vadd.f32 %v216_v54, %v82_v49  ;;  %v504_v49 = vld [vmem:[%s1133_s7 + $0x8] sm:$0xff]  ;;  %v910_v50 = vmov 0.0|0.0   ;;  %v912_v51 = vmov 0.0   ;;  %v510_v54 = vpop.permute.xlu0 %509  ;;  %s913_s7 = smov [#allocation3]  }
  0xec   :  { %v240_v57 = vmax.f32 %v222_v53, 0.0  ;;  %s697_s10 = sshll.u32 %s913_s7, 4  ;;  %s698_s10 = int_to_ptr.vmem [resolvable:$true] %s697_s10 }
  0xed   :  { %v239_v59 = vmax.f32 %v217_v56, 0.0  ;;  %v780_v60 = vpop.f32.mrb[6].mxu0  ;;  %846 = vmatprep.subr.bf16.mxu1 %v845_v55  ;;  %s889_s4 = scalar_lea.vmem %s698_s10, 32  ;;  %p890_p1 = scmp.lt.s32.totalorder %s698_s10, %s698_s10 }
  0xee   :  { %v232_v62 = vadd.f32 %v780_v60, %v97_v58  ;;  %v226_v63 = vpop.f32.mrb[7].mxu0  ;;  %848 = vmatpush3.bf16.msra.mxu1 %v845_v55 }
  0xef   :  { %v849_v0 = vpack.c.bf16 %v240_v57, %v239_v59  ;;  %v227_v1 = vadd.f32 %v226_v63, %v92_v61  ;;  %v600_v61 = vld [vmem:[%s1135_s9] sm:$0x1]  ;;  %s885_s9 = scalar_lea.vmem %s698_s10, 16 }
  0xf0   :  { %v242_v2 = vmax.f32 %v232_v62, 0.0  ;;  %v607_v62 = vlaneseq  ;;  %p886_p0 = scmp.ne.s32.totalorder %s698_s10, %s885_s9  ;;  %p891_p2 = scmp.lt.s32.totalorder %s889_s4, %s885_s9 }
  0xf1   :  { %v241_v3 = vmax.f32 %v227_v1, 0.0  ;;  %850 = vmatprep.subr.bf16.mxu1 %v849_v0  ;;  %v605_v1 = vpop.permute.xlu0 %604 }
  0xf2   :  { %852 = vmatpush3.bf16.msra.mxu1 %v849_v0  ;;  %v608_v63 = vshrl.u32 %v607_v62, 7  ;;  %p892_p3 = por %p891_p2, %p890_p1 }
  0xf3   :  { %v853_v4 = vpack.c.bf16 %v242_v2, %v241_v3 }
  0xf4   :  { %v609_v0 = vsub.s32 0, %v608_v63  ;;  %p893_p4 = pnand %p892_p3, %p886_p0 }
  0xf5   :  { %854 = vmatprep.subr.bf16.mxu1 %v853_v4 }
  0xf6   :  { %856 = vmatpush3.bf16.msra.mxu1 %v853_v4  ;;  %v610_v2 = vrot.slane %v605_v1, %v609_v0 }
  0xf9   :  { %798 = vmatmul.mubr.msk.f32.vlgmr.msra.gmra.mrb[0].mxu1 %vm271_vm2, %v244_v5 }
  0xfa   :  { %800 = vmatprep.mubr.msk.f32.mxu1 %vm271_vm2, %v245_v6 }
  0xfd   :  { %801 = vmatmul.mubr.msk.f32.gmra.mrb[2].mxu1 %vm271_vm2, %v246_v7 }
  0xfe   :  { %825 = vmatprep.mubr.msk.f32.mxu1 %vm401_vm3, %v503_v30 }
 0x1cc   :  { %v799_v11 = vpop.f32.mrb[0].mxu1 }
 0x1cd   :  { %v356_v12 = vadd.f32 %v799_v11, %v259_v9  ;;  %v350_v13 = vpop.f32.mrb[1].mxu1 }
 0x1ce   :  { %v351_v14 = vadd.f32 %v350_v13, %v254_v10 }
 0x1cf   :  { %v370_v15 = vmax.f32 %v356_v12, 0.0 }
 0x1d0   :  { %v369_v17 = vmax.f32 %v351_v14, 0.0  ;;  %v802_v18 = vpop.f32.mrb[2].mxu1 }
 0x1d1   :  { %v366_v20 = vadd.f32 %v802_v18, %v269_v16  ;;  %v360_v21 = vpop.f32.mrb[3].mxu1 }
 0x1d2   :  { %v857_v22 = vpack.c.bf16 %v370_v15, %v369_v17  ;;  %v361_v23 = vadd.f32 %v360_v21, %v264_v19 }
 0x1d3   :  { %v372_v24 = vmax.f32 %v366_v20, 0.0 }
 0x1d4   :  { %v371_v25 = vmax.f32 %v361_v23, 0.0  ;;  %858 = vmatprep.subr.bf16.mxu0 %v857_v22 }
 0x1d5   :  { %860 = vmatpush3.bf16.msra.mxu0 %v857_v22 }
 0x1d6   :  { %v861_v26 = vpack.c.bf16 %v372_v24, %v371_v25 }
 0x1d8   :  { %862 = vmatprep.subr.bf16.mxu0 %v861_v26 }
 0x1d9   :  { %864 = vmatpush3.bf16.msra.mxu0 %v861_v26 }
 0x1dc   :  { %812 = vmatmul.mubr.msk.f32.vlgmr.msra.gmra.mrb[8].mxu0 %vm401_vm3, %v374_v27 }
 0x1dd   :  { %814 = vmatprep.mubr.msk.f32.mxu0 %vm401_vm3, %v375_v28 }
 0x1e0   :  { %815 = vmatmul.mubr.msk.f32.gmra.mrb[10].mxu0 %vm401_vm3, %v376_v29 }
 0x2af   :  { %v813_v33 = vpop.f32.mrb[8].mxu0 }
 0x2b0   :  { %v486_v34 = vadd.f32 %v813_v33, %v389_v31  ;;  %v480_v35 = vpop.f32.mrb[9].mxu0 }
 0x2b1   :  { %v481_v36 = vadd.f32 %v480_v35, %v384_v32 }
 0x2b2   :  { %v500_v37 = vmax.f32 %v486_v34, 0.0 }
 0x2b3   :  { %v499_v39 = vmax.f32 %v481_v36, 0.0  ;;  %v816_v40 = vpop.f32.mrb[10].mxu0 }
 0x2b4   :  { %v496_v42 = vadd.f32 %v816_v40, %v399_v38  ;;  %v490_v43 = vpop.f32.mrb[11].mxu0 }
 0x2b5   :  { %v865_v44 = vpack.c.bf16 %v500_v37, %v499_v39  ;;  %v491_v45 = vadd.f32 %v490_v43, %v394_v41 }
 0x2b6   :  { %v502_v46 = vmax.f32 %v496_v42, 0.0 }
 0x2b7   :  { %v501_v47 = vmax.f32 %v491_v45, 0.0  ;;  %866 = vmatprep.subr.bf16.mxu1 %v865_v44 }
 0x2b8   :  { %868 = vmatpush3.bf16.msra.mxu1 %v865_v44 }
 0x2b9   :  { %v869_v48 = vpack.c.bf16 %v502_v46, %v501_v47 }
 0x2bb   :  { %870 = vmatprep.subr.bf16.mxu1 %v869_v48 }
 0x2bc   :  { %872 = vmatpush3.bf16.msra.mxu1 %v869_v48 }
 0x2bd   :  { %873 = vmatprep.subr.bf16.mxu1 %v910_v50 }
 0x2bf   :  { %826 = vmatmul.mubr.msk.f32.vlgmr.msra.gmra.mrb[4].mxu1 %vm401_vm3, %v504_v49 }
 0x2c0   :  { %832 = vmatprep.mubr.msk.f32.mxu1 %vm911_vm4, %v912_v51 }
 0x392   :  { %v827_v53 = vpop.f32.mrb[4].mxu1 }
 0x393   :  { %v595_v55 = vadd.f32 %v827_v53, %v515_v52  ;;  %v589_v56 = vpop.f32.mrb[5].mxu1 }
 0x394   :  { %v590_v57 = vadd.f32 %v589_v56, %v510_v54 }
 0x395   :  { %v599_v58 = vmax.f32 %v595_v55, 0.0 }
 0x396   :  { %v598_v59 = vmax.f32 %v590_v57, 0.0 }
 0x398   :  { %v874_v60 = vpack.c.bf16 %v599_v58, %v598_v59 }
 0x39a   :  { %875 = vmatpush3.bf16.msra.mxu1 %v874_v60 }
 0x39d   :  { %833 = vmatmul.mubr.msk.f32.vlgmr.msra.gmra.mrb[6].mxu1 %vm611_vm5, %v600_v61 }
 0x470   :  { %v681_v3 = vpop.f32.mrb[6].mxu1 }
 0x471   :  { %v682_v4 = vadd.f32 %v681_v3, %v610_v2  ;;  %v834_v5 = vpop.f32.mrb[7].mxu1 }
 0x473   :  { %v685_v6 = vmul.f32 0.5, %v682_v4 }
 0x475   :  { %883 = vtanh.f32 %v685_v6 }
 0x47f   :  { %v884_v7 = vpop.eup %883 }
 0x480   :  { %v687_v8 = vadd.f32 1.0, %v884_v7 }
 0x482   :  { %v688_v9 = vmul.f32 0.5, %v687_v8 }
 0x484   :  { %690 = vst.msk [vmem:[#allocation3] sm:$0x1] %vm689_vm6, %v688_v9 }
 0x485   :  { %896 = shalt.err (!%p893_p4)
}
 0x486   :  { %s897_s26 = scalar_lea.hbm %s1137_s11, 16 }
 0x487   :  { %p898_p5 = scmp.ne.s32.totalorder %s1137_s11, %s897_s26  ;;  %p901_p6 = scmp.lt.u32.totalorder %s897_s26, %s1137_s11 }
 0x489   :  { %p903_p7 = pnand %p901_p6, %p898_p5 }
 0x48b   :  { %906 = shalt.err (!%p903_p7)
}
 0x48c   :  { %700 = dma.vmem_to_hbm [thread:$0]  %s698_s10, 16, %s1137_s11, [#allocation4]  }
 0x48d   :  { %907 = dma.done.wait [#allocation4], 16  }
 0x48e   :  { %908 = vsyncadd [#allocation4], 4294967280 }
 0x48f   :  { %704 = vsyncpa [#allocation4], 1 }

</bundles_post_ra>
